<compile_context>
chip_gen: v7x
topology: tpu7x:2x2x1
jax: 0.10.0
libtpu: 0.0.40
codegen_flags: <defaults>
</compile_context>

<pallas_src>
import functools

import jax
import jax.numpy as jnp
from jax import lax
from jax.experimental import pallas as pl
from jax.experimental.pallas import tpu as pltpu


def _preloss_kernel(hv_ref, ha_ref, hb_ref, out_ref, acc_ref, *,
                    inv_tau, eps, batch, tile_b):
    i = pl.program_id(0)

    @pl.when(i == 0)
    def _init():
        acc_ref[0, 0] = jnp.float32(0.0)

    hv = hv_ref[...].astype(jnp.float32)
    ha = ha_ref[...].astype(jnp.float32)
    hb = hb_ref[...].astype(jnp.float32)

    # Row-wise dot products / squared norms over the feature (lane) axis.
    dot_va = jnp.sum(hv * ha, axis=1, keepdims=True)     # [TB, 1]
    dot_vb = jnp.sum(hv * hb, axis=1, keepdims=True)
    ssq_v = jnp.sum(hv * hv, axis=1, keepdims=True)
    ssq_a = jnp.sum(ha * ha, axis=1, keepdims=True)
    ssq_b = jnp.sum(hb * hb, axis=1, keepdims=True)

    # cosine_similarity(x1, x2): x1.x2 * rsqrt(max(||x1||^2 * ||x2||^2, eps^2))
    eps2 = jnp.float32(eps * eps)
    sim_v_a = dot_va * lax.rsqrt(jnp.maximum(ssq_v * ssq_a, eps2))
    sim_v_b = dot_vb * lax.rsqrt(jnp.maximum(ssq_v * ssq_b, eps2))

    # -log(exp(a/tau) / exp(b/tau)) == (b - a) / tau  (folded)
    per_row = (sim_v_b - sim_v_a) * jnp.float32(inv_tau)  # [TB, 1]

    # Mask padded rows of the (ragged) last tile so they don't pollute the mean.
    if batch % tile_b != 0:
        row_ids = i * tile_b + lax.broadcasted_iota(jnp.int32, (tile_b, 1), 0)
        per_row = jnp.where(row_ids < batch, per_row, 0.0)

    acc_ref[0, 0] += jnp.sum(per_row)

    @pl.when(i == pl.num_programs(0) - 1)
    def _finalize():
        out_ref[0, 0] = acc_ref[0, 0] * jnp.float32(1.0 / batch)


def custom_pre_loss(h_vt, h_at, h_bt, tau=1.0, eps=1e-8, tile_b=None):
    """Pallas implementation of CustomPreLoss.forward. Inputs: [B, D]."""
    assert h_vt.shape == h_at.shape == h_bt.shape and h_vt.ndim == 2
    B, D = h_vt.shape
    itemsize = jnp.dtype(h_vt.dtype).itemsize
    min_rows = 16 if itemsize == 2 else 8   # bf16 packs 16 sublanes per vreg

    if tile_b is None:
        # 3 inputs x 2 pipeline buffers x (tile_b, D) tiles must fit comfortably in
        # VMEM (v7x has only 64 MiB physical): budget ~24 MiB for the input buffers.
        budget = 24 * 1024 * 1024
        cap = max(min_rows, (budget // (6 * D * itemsize)) // min_rows * min_rows)
        tile_b = min(512, cap)
    tile_b = max(min_rows, (tile_b // min_rows) * min_rows)
    tile_b = min(tile_b, max(min_rows, pl.cdiv(B, min_rows) * min_rows))

    grid = (pl.cdiv(B, tile_b),)

    kernel = functools.partial(
        _preloss_kernel,
        inv_tau=1.0 / float(tau),
        eps=float(eps),
        batch=B,
        tile_b=tile_b,
    )

    out = pl.pallas_call(
        kernel,
        out_shape=jax.ShapeDtypeStruct((1, 1), jnp.float32),
        grid_spec=pltpu.PrefetchScalarGridSpec(
            num_scalar_prefetch=0,
            grid=grid,
            in_specs=[
                pl.BlockSpec((tile_b, D), lambda i: (i, 0)),
                pl.BlockSpec((tile_b, D), lambda i: (i, 0)),
                pl.BlockSpec((tile_b, D), lambda i: (i, 0)),
            ],
            out_specs=pl.BlockSpec(memory_space=pltpu.MemorySpace.SMEM),
            scratch_shapes=[pltpu.SMEM((1, 1), jnp.float32)],
        ),
        compiler_params=pltpu.CompilerParams(
            dimension_semantics=("arbitrary",),
            vmem_limit_bytes=32 * 1024 * 1024,
        ),
    )(h_vt, h_at, h_bt)
    return out[0, 0]


if __name__ == "__main__":
    key = jax.random.PRNGKey(0)
    k1, k2, k3 = jax.random.split(key, 3)

    # Small shapes; B=20 with tile_b=8 exercises the multi-tile grid, the
    # cross-tile accumulator and the ragged-last-tile mask.
    B, D = 20, 128
    tau = 0.5
    h_vt = jax.random.normal(k1, (B, D), dtype=jnp.float32)
    h_at = jax.random.normal(k2, (B, D), dtype=jnp.float32)
    h_bt = jax.random.normal(k3, (B, D), dtype=jnp.float32)

    loss = custom_pre_loss(h_vt, h_at, h_bt, tau=tau, tile_b=8)
    jax.block_until_ready(loss)

    # Pure-JAX reference (mirrors torch.nn.functional.cosine_similarity and the
    # original exp/log formulation).
    def ref(hv, ha, hb, tau=1.0, eps=1e-8):
        def cos(x, y):
            w12 = jnp.sum(x * y, axis=1)
            w1 = jnp.sum(x * x, axis=1)
            w2 = jnp.sum(y * y, axis=1)
            return w12 / jnp.sqrt(jnp.maximum(w1 * w2, eps * eps))
        a = cos(hv, ha) / tau
        b = cos(hv, hb) / tau
        return -jnp.mean(jnp.log(jnp.exp(a) / jnp.exp(b)))

    expected = ref(h_vt, h_at, h_bt, tau=tau)
    assert jnp.allclose(loss, expected, atol=1e-5, rtol=1e-5), (loss, expected)

    print("KERNEL_OK")
</pallas_src>

<mosaic_0001>
module attributes {stable_mosaic.version = 11 : i64} {
  func.func @_preloss_kernel(%arg0: i32, %arg1: memref<8x128xf32, #tpu.memory_space<vmem>>, %arg2: memref<8x128xf32, #tpu.memory_space<vmem>>, %arg3: memref<8x128xf32, #tpu.memory_space<vmem>>, %arg4: memref<1x1xf32, #tpu.memory_space<smem>>, %arg5: memref<1x1xf32, #tpu.memory_space<smem>>) attributes {dimension_semantics = [#tpu.dimension_semantics<arbitrary>], iteration_bounds = array<i64: 3>, scalar_prefetch = 0 : i64, scratch_operands = 1 : i64, tpu.core_type = #tpu.core_type<tc>, window_params = [{transform_indices = @transform_0, window_bounds = array<i64: 8, 128>}, {transform_indices = @transform_1, window_bounds = array<i64: 8, 128>}, {transform_indices = @transform_2, window_bounds = array<i64: 8, 128>}, {transform_indices = @transform_3, window_bounds = array<i64: 1, 1>}]} {
    %c0_i32 = arith.constant 0 : i32
    %0 = arith.cmpi eq, %arg0, %c0_i32 : i32
    %1 = arith.extui %0 : i1 to i32
    %c0_i32_0 = arith.constant 0 : i32
    %2 = arith.cmpi ne, %1, %c0_i32_0 : i32
    scf.if %2 {
      %cst_20 = arith.constant 0.000000e+00 : f32
      %c0_21 = arith.constant 0 : index
      %c0_22 = arith.constant 0 : index
      %52 = memref.load %arg5[%c0_21, %c0_22] : memref<1x1xf32, #tpu.memory_space<smem>>
      memref.store %cst_20, %arg5[%c0_21, %c0_22] : memref<1x1xf32, #tpu.memory_space<smem>>
    } else {
    }
    %c0 = arith.constant 0 : index
    %c0_1 = arith.constant 0 : index
    %3 = vector.load %arg1[%c0, %c0_1] : memref<8x128xf32, #tpu.memory_space<vmem>>, vector<8x128xf32>
    %c0_2 = arith.constant 0 : index
    %c0_3 = arith.constant 0 : index
    %4 = vector.load %arg2[%c0_2, %c0_3] : memref<8x128xf32, #tpu.memory_space<vmem>>, vector<8x128xf32>
    %c0_4 = arith.constant 0 : index
    %c0_5 = arith.constant 0 : index
    %5 = vector.load %arg3[%c0_4, %c0_5] : memref<8x128xf32, #tpu.memory_space<vmem>>, vector<8x128xf32>
    %6 = arith.mulf %3, %4 : vector<8x128xf32>
    %cst = arith.constant dense<0.000000e+00> : vector<8xf32>
    %7 = vector.multi_reduction <add>, %6, %cst [1] : vector<8x128xf32> to vector<8xf32>
    %8 = vector.shape_cast %7 : vector<8xf32> to vector<8x1xf32>
    %9 = arith.mulf %3, %5 : vector<8x128xf32>
    %cst_6 = arith.constant dense<0.000000e+00> : vector<8xf32>
    %10 = vector.multi_reduction <add>, %9, %cst_6 [1] : vector<8x128xf32> to vector<8xf32>
    %11 = vector.shape_cast %10 : vector<8xf32> to vector<8x1xf32>
    %12 = arith.mulf %3, %3 : vector<8x128xf32>
    %cst_7 = arith.constant dense<0.000000e+00> : vector<8xf32>
    %13 = vector.multi_reduction <add>, %12, %cst_7 [1] : vector<8x128xf32> to vector<8xf32>
    %14 = vector.shape_cast %13 : vector<8xf32> to vector<8x1xf32>
    %15 = arith.mulf %4, %4 : vector<8x128xf32>
    %cst_8 = arith.constant dense<0.000000e+00> : vector<8xf32>
    %16 = vector.multi_reduction <add>, %15, %cst_8 [1] : vector<8x128xf32> to vector<8xf32>
    %17 = vector.shape_cast %16 : vector<8xf32> to vector<8x1xf32>
    %18 = arith.mulf %5, %5 : vector<8x128xf32>
    %cst_9 = arith.constant dense<0.000000e+00> : vector<8xf32>
    %19 = vector.multi_reduction <add>, %18, %cst_9 [1] : vector<8x128xf32> to vector<8xf32>
    %20 = vector.shape_cast %19 : vector<8xf32> to vector<8x1xf32>
    %21 = arith.mulf %14, %17 : vector<8x1xf32>
    %cst_10 = arith.constant 1.000000e-16 : f32
    %22 = vector.broadcast %cst_10 : f32 to vector<8x1xf32>
    %23 = arith.maximumf %21, %22 : vector<8x1xf32>
    %24 = math.rsqrt %23 : vector<8x1xf32>
    %25 = arith.mulf %8, %24 : vector<8x1xf32>
    %26 = arith.mulf %14, %20 : vector<8x1xf32>
    %cst_11 = arith.constant 1.000000e-16 : f32
    %27 = vector.broadcast %cst_11 : f32 to vector<8x1xf32>
    %28 = arith.maximumf %26, %27 : vector<8x1xf32>
    %29 = math.rsqrt %28 : vector<8x1xf32>
    %30 = arith.mulf %11, %29 : vector<8x1xf32>
    %31 = arith.subf %30, %25 : vector<8x1xf32>
    %cst_12 = arith.constant 2.000000e+00 : f32
    %32 = vector.broadcast %cst_12 : f32 to vector<8x1xf32>
    %33 = arith.mulf %31, %32 : vector<8x1xf32>
    %c8_i32 = arith.constant 8 : i32
    %34 = arith.muli %arg0, %c8_i32 : i32
    %35 = tpu.iota {dimensions = array<i32: 0>} : vector<8x1xi32>
    %36 = vector.broadcast %34 : i32 to vector<8x1xi32>
    %37 = arith.addi %36, %35 : vector<8x1xi32>
    %c20_i32 = arith.constant 20 : i32
    %38 = vector.broadcast %c20_i32 : i32 to vector<8x1xi32>
    %39 = arith.cmpi slt, %37, %38 : vector<8x1xi32>
    %cst_13 = arith.constant 0.000000e+00 : f32
    %40 = vector.broadcast %cst_13 : f32 to vector<8x1xf32>
    %41 = arith.select %39, %33, %40 : vector<8x1xi1>, vector<8x1xf32>
    %c0_14 = arith.constant 0 : index
    %c0_15 = arith.constant 0 : index
    %42 = memref.load %arg5[%c0_14, %c0_15] : memref<1x1xf32, #tpu.memory_space<smem>>
    %43 = vector.shape_cast %41 : vector<8x1xf32> to vector<1x8x1xf32>
    %cst_16 = arith.constant dense<0.000000e+00> : vector<1xf32>
    %44 = vector.multi_reduction <add>, %43, %cst_16 [1, 2] : vector<1x8x1xf32> to vector<1xf32>
    %45 = vector.shape_cast %44 : vector<1xf32> to vector<1x1x1xf32>
    %46 = vector.extract %45[0, 0, 0] : f32 from vector<1x1x1xf32>
    %47 = arith.addf %42, %46 : f32
    %c0_17 = arith.constant 0 : index
    %c0_18 = arith.constant 0 : index
    %48 = memref.load %arg5[%c0_17, %c0_18] : memref<1x1xf32, #tpu.memory_space<smem>>
    memref.store %47, %arg5[%c0_17, %c0_18] : memref<1x1xf32, #tpu.memory_space<smem>>
    %c2_i32 = arith.constant 2 : i32
    %49 = arith.cmpi eq, %arg0, %c2_i32 : i32
    %50 = arith.extui %49 : i1 to i32
    %c0_i32_19 = arith.constant 0 : i32
    %51 = arith.cmpi ne, %50, %c0_i32_19 : i32
    scf.if %51 {
      %c0_20 = arith.constant 0 : index
      %c0_21 = arith.constant 0 : index
      %52 = memref.load %arg5[%c0_20, %c0_21] : memref<1x1xf32, #tpu.memory_space<smem>>
      %cst_22 = arith.constant 5.000000e-02 : f32
      %53 = arith.mulf %52, %cst_22 : f32
      %c0_23 = arith.constant 0 : index
      %c0_24 = arith.constant 0 : index
      %54 = memref.load %arg4[%c0_23, %c0_24] : memref<1x1xf32, #tpu.memory_space<smem>>
      memref.store %53, %arg4[%c0_23, %c0_24] : memref<1x1xf32, #tpu.memory_space<smem>>
    } else {
    }
    return
  }
  func.func @transform_0(%arg0: i32) -> (i32, i32) {
    %c0_i32 = arith.constant 0 : i32
    %c0_i32_0 = arith.constant 0 : i32
    return %arg0, %c0_i32 : i32, i32
  }
  func.func @transform_1(%arg0: i32) -> (i32, i32) {
    %c0_i32 = arith.constant 0 : i32
    %c0_i32_0 = arith.constant 0 : i32
    return %arg0, %c0_i32 : i32, i32
  }
  func.func @transform_2(%arg0: i32) -> (i32, i32) {
    %c0_i32 = arith.constant 0 : i32
    %c0_i32_0 = arith.constant 0 : i32
    return %arg0, %c0_i32 : i32, i32
  }
  func.func @transform_3(%arg0: i32) -> (i32, i32) {
    %c0_i32 = arith.constant 0 : i32
    %c0_i32_0 = arith.constant 0 : i32
    %c0_i32_1 = arith.constant 0 : i32
    return %c0_i32, %c0_i32_0 : i32, i32
  }
}

</mosaic_0001>

<bundles_post_ra>
// kernel: tpu_custom_call.1
= control target key start
LH: loop header
LB: loop body
LE: loop exit
PB: predicated region body
PF: predicated region fallthrough
CT: control target
= control target key end

     0   :  { %8 = vsyncpa [#allocation4], 0  ;;  %s880_s0 = inlined_call_operand.hbm [shape: f32[20,128], index: 0, kind: input, shape index: {}]   ;;  %s881_s1 = inlined_call_operand.hbm [shape: f32[20,128], index: 1, kind: input, shape index: {}]   ;;  %s882_s2 = inlined_call_operand.hbm [shape: f32[20,128], index: 2, kind: input, shape index: {}]   ;;  %s883_s3 = inlined_call_operand.hbm [shape: f32[1,1], index: 3, kind: output, shape index: {}]  }
   0x1   :  { %10 = vsyncpa [#allocation4 + $0x1], 0 }
   0x2   :  { %11 = vsyncpa [#allocation7], 0 }
   0x3   :  { %13 = vsyncpa [#allocation7 + $0x1], 0 }
   0x4   :  { %14 = vsyncpa [#allocation5], 0  ;;  %s668_s12 = smov 0   ;;  %s670_s13 = smov 0  }
   0x5   :  { %s672_s14 = smov 0   ;;  %s674_s15 = smov 0  }
   0x6 LB: > { %s687_s16 = sadd.s32 4294967295, %s641_s15   ;;  %s690_s17 = sadd.s32 1, %s641_s15   ;;  %s641_s15 = sphi %s674_s15, %s900_s15   ;;  %s637_s14 = sphi %s672_s14, %s899_s14   ;;  %s633_s13 = sphi %s670_s13, %s898_s13   ;;  %s629_s12 = sphi %s668_s12, %s897_s12  }
   0x7   : > { %s24_s18 = ssub.s32 %s641_s15, %s690_s17  ;;  %s27_s19 = sadd.s32 1, %s637_s14 }
   0x8   : > { %p25_p0 = scmp.eq.s32.totalorder %s24_s18, 0  ;;  %p34_p1 = scmp.ne.s32.totalorder %s637_s14, %s633_s13 }
   0x9   : > { %p35_p2 = scmp.eq.s32.totalorder %s641_s15, 0  ;;  %p40_p3 = scmp.ne.s32.totalorder %s633_s13, %s629_s12 }
   0xa   : > { %s700_s20 = scalar_select %p25_p0, %s637_s14, %s27_s19  }
   0xb   : > { %p36_p4 = por %p35_p2, %p34_p1  ;;  %p884_p5 = scmp.eq.s32.totalorder %s687_s16, 0 }
   0xc   : > { %p454_p6 = scmp.lt.s32.totalorder %s641_s15, 3  ;;  %s137_s22 = sand.u32 1, %s637_s14  }
   0xd   : > { %p706_p7 = por %p884_p5, %p40_p3  ;;  %s713_s23 = sshll.u32 %s137_s22, 3 }
   0xe   : > { %s716_s24 = sshll.u32 %s641_s15, 7  ;;  %p718_p8 = pnand %p454_p6, %p36_p4 }
   0xf   : > { %s887_s21 = scalar_select %p706_p7, 1, 0 }
  0x10   : > { %s888_s25 = scalar_select %p718_p8, 1, 0 }
  0x11   : > { %s155_s26 = sand.u32 1, %s641_s15   ;;  %s727_s29 = scalar_lea.hbm %s881_s1, %s716_s24 }
  0x12   : > { %s159_s30 = scalar_lea.vmem [#allocation6], %s713_s23  ;;  %s734_s5 = scalar_lea.sflag [#allocation7], %s155_s26 }
  0x13   : > { %s166_s4 = sshll.u32 %s159_s30, 4  ;;  %s497_s6 = scalar_lea.hbm %s727_s29, 128  ;;  %s731_s4 = int_to_ptr.vmem [resolvable:$true] %s166_s4 }
  0x14   : > { %p498_p11 = scmp.ne.s32.totalorder %s727_s29, %s497_s6  ;;  %p740_p12 = pneg %p718_p8 }
  0x15   : > { %s502_s10 = scalar_lea.hbm %s881_s1, 384  ;;  %p503_p1 = scmp.lt.u32.totalorder %s727_s29, %s881_s1 }
  0x16   : > { %p500_p13 = pnand %p740_p12, %p498_p11  ;;  %p504_p2 = scmp.lt.u32.totalorder %s502_s10, %s497_s6 }
  0x17   : > { %p506_p4 = scmp.lt.u32.totalorder %s497_s6, %s727_s29 }
  0x18   : > { %p501_p0 = pneg %p500_p13  ;;  %p505_p3 = por %p504_p2, %p503_p1 }
  0x1a   : > { %p507_p6 = por %p506_p4, %p505_p3 }
  0x1c   : > { %p508_p5 = pnand %p507_p6, %p501_p0 }
  0x1e   : > { %511 = shalt.err (!%p508_p5)
}
  0x1f   : > { %s512_s18 = scalar_lea.vmem %s731_s4, 128  ;;  %s643_s19 = smov [#allocation6]  }
  0x20   : > { %p513_p11 = scmp.ne.s32.totalorder %s731_s4, %s512_s18  ;;  %s517_s26 = sshll.u32 %s643_s19, 4  ;;  %s518_s26 = int_to_ptr.vmem [resolvable:$false] %s517_s26 }
  0x21   : > { %s519_s27 = scalar_lea.vmem %s518_s26, 256  ;;  %p520_p10 = scmp.lt.s32.totalorder %s731_s4, %s518_s26 }
  0x22   : > { %p515_p13 = pnand %p513_p11, %p740_p12  ;;  %p521_p7 = scmp.lt.s32.totalorder %s519_s27, %s512_s18 }
  0x24   : > { %p516_p9 = pneg %p515_p13  ;;  %p522_p1 = por %p521_p7, %p520_p10 }
  0x26   : > { %p523_p2 = pnand %p522_p1, %p516_p9 }
  0x28   : > { %526 = shalt.err (!%p523_p2)
}
  0x29   : > { %450 = dma.hbm_to_vmem [thread:$0]  (!%p718_p8), %s727_s29, 128, %s731_s4, %s734_s5  }
  0x2a   : > { %p890_p5 = scmp.lt.s32.totalorder %s641_s15, 4  ;;  %p891_p0 = scmp.ge.s32.totalorder %s641_s15, 1 }
  0x2b   : > { %s776_s8 = scalar_lea.hbm %s880_s0, %s716_s24  ;;  %s141_s9 = scalar_lea.vmem [#allocation3], %s713_s23 }
  0x2c   : > { %p768_p3 = pnand %p891_p0, %p890_p5  ;;  %s148_s10 = sshll.u32 %s141_s9, 4  ;;  %s779_s10 = int_to_ptr.vmem [resolvable:$true] %s148_s10 }
  0x2d   : > { %s785_s15 = scalar_lea.hbm %s882_s2, %s716_s24  ;;  %s138_s11 = scalar_lea.sflag [#allocation4], %s137_s22 }
  0x2e   : > { %s892_s28 = scalar_select %p768_p3, 1, 0 }
  0x2f   : > { %s527_s12 = scalar_lea.hbm %s776_s8, 128  ;;  %s532_s26 = scalar_lea.hbm %s880_s0, 384 }
  0x30   : > { %p528_p7 = scmp.ne.s32.totalorder %s776_s8, %s527_s12  ;;  %p533_p4 = scmp.lt.u32.totalorder %s776_s8, %s880_s0 }
  0x31   : > { %p534_p6 = scmp.lt.u32.totalorder %s532_s26, %s527_s12  ;;  %p536_p13 = scmp.lt.u32.totalorder %s527_s12, %s776_s8 }
  0x32   : > { %p530_p9 = pnand %p528_p7, %p740_p12 }
  0x33   : > { %p535_p11 = por %p534_p6, %p533_p4 }
  0x34   : > { %p531_p10 = pneg %p530_p9 }
  0x35   : > { %p537_p1 = por %p536_p13, %p535_p11 }
  0x37   : > { %p538_p2 = pnand %p537_p1, %p531_p10 }
  0x39   : > { %541 = shalt.err (!%p538_p2)
}
  0x3a   : > { %s542_s22 = scalar_lea.vmem %s779_s10, 128  ;;  %s644_s24 = smov [#allocation3]  }
  0x3b   : > { %p543_p5 = scmp.ne.s32.totalorder %s779_s10, %s542_s22  ;;  %s547_s6 = sshll.u32 %s644_s24, 4  ;;  %s548_s6 = int_to_ptr.vmem [resolvable:$false] %s547_s6 }
  0x3c   : > { %s549_s9 = scalar_lea.vmem %s548_s6, 256  ;;  %p550_p9 = scmp.lt.s32.totalorder %s779_s10, %s548_s6 }
  0x3d   : > { %p545_p0 = pnand %p543_p5, %p740_p12  ;;  %p551_p3 = scmp.lt.s32.totalorder %s549_s9, %s542_s22 }
  0x3f   : > { %p546_p7 = pneg %p545_p0  ;;  %p552_p4 = por %p551_p3, %p550_p9 }
  0x41   : > { %p553_p6 = pnand %p552_p4, %p546_p7 }
  0x43   : > { %556 = shalt.err (!%p553_p6)
}
  0x44   : > { %447 = dma.hbm_to_vmem [thread:$0]  (!%p718_p8), %s776_s8, 128, %s779_s10, %s138_s11  }
  0x45   : > { %s177_s29 = scalar_lea.vmem [#allocation8], %s713_s23  ;;  %s557_s12 = scalar_lea.hbm %s785_s15, 128 }
  0x46   : > { %s184_s4 = sshll.u32 %s177_s29, 4  ;;  %p558_p10 = scmp.ne.s32.totalorder %s785_s15, %s557_s12  ;;  %s185_s4 = int_to_ptr.vmem [resolvable:$true] %s184_s4 }
  0x47   : > { %s562_s26 = scalar_lea.hbm %s882_s2, 384  ;;  %p563_p13 = scmp.lt.u32.totalorder %s785_s15, %s882_s2 }
  0x48   : > { %p560_p3 = pnand %p558_p10, %p740_p12  ;;  %p564_p1 = scmp.lt.u32.totalorder %s562_s26, %s557_s12 }
  0x49   : > { %p566_p5 = scmp.lt.u32.totalorder %s557_s12, %s785_s15 }
  0x4a   : > { %p561_p11 = pneg %p560_p3  ;;  %p565_p2 = por %p564_p1, %p563_p13 }
  0x4c   : > { %p567_p0 = por %p566_p5, %p565_p2 }
  0x4e   : > { %p568_p7 = pnand %p567_p0, %p561_p11 }
  0x50   : > { %571 = shalt.err (!%p568_p7)
}
  0x51   : > { %s572_s23 = scalar_lea.vmem %s185_s4, 128  ;;  %s645_s8 = smov [#allocation8]  }
  0x52   : > { %p573_p9 = scmp.ne.s32.totalorder %s185_s4, %s572_s23  ;;  %s577_s10 = sshll.u32 %s645_s8, 4  ;;  %s578_s10 = int_to_ptr.vmem [resolvable:$false] %s577_s10 }
  0x53   : > { %s579_s11 = scalar_lea.vmem %s578_s10, 256  ;;  %p580_p10 = scmp.lt.s32.totalorder %s185_s4, %s578_s10 }
  0x54   : > { %p575_p4 = pnand %p573_p9, %p740_p12  ;;  %p581_p3 = scmp.lt.s32.totalorder %s579_s11, %s572_s23 }
  0x56   : > { %p576_p6 = pneg %p575_p4  ;;  %p582_p8 = por %p581_p3, %p580_p10 }
  0x58   : > { %p583_p1 = pnand %p582_p8, %p576_p6 }
  0x5a   : > { %586 = shalt.err (!%p583_p1)
}
  0x5b   : > { %p893_p13 = scmp.ne.s32.totalorder %s888_s25, 0  ;;  %p894_p11 = scmp.ne.s32.totalorder %s892_s28, 0 }
  0x5c   : > { %s195_s7 = sand.u32 (!%p894_p11), 1, %s633_s13   ;;  %p895_p12 = scmp.ne.s32.totalorder (!%p894_p11), %s887_s21, 0 }
  0x5d   : > { %453 = dma.hbm_to_vmem [thread:$0]  (!%p893_p13), %s785_s15, 128, %s185_s4, %s734_s5  }
  0x5e   : > { %193 = sbr.rel (%p894_p11) target bundleno = 492 (0x1ec), region = 32  ;;  %s418_s22 = sshll.u32 (!%p894_p11), %s195_s7, 3 }
  0x5f   : > { %s196_s24 = scalar_lea.sflag (!%p894_p11), [#allocation4], %s195_s7  ;;  %s199_s6 = scalar_lea.vmem (!%p894_p11), [#allocation3], %s418_s22 }
  0x65   : > { %616 = dma.done.wait (%p895_p12), %s196_s24, 128  }
  0x66   : > { %618 = vsyncadd (%p895_p12), %s196_s24, 4294967168  ;;  %s204_s25 = sand.u32 1, %s687_s16   ;;  %s208_s29 = scalar_lea.vmem [#allocation6], %s418_s22 }
  0x67   : > { %s205_s9 = scalar_lea.sflag [#allocation7], %s204_s25 }
  0x68   : > { %620 = dma.done.wait (%p895_p12), %s205_s9, 256  }
  0x69   : > { %622 = vsyncadd (%p895_p12), %s205_s9, 4294967040  ;;  %s217_s5 = scalar_lea.vmem [#allocation8], %s418_s22  ;;  %v251_v1 = vld [vmem:[%s199_s6] sm:$0xff]  ;;  %v252_v2 = vld [vmem:[%s208_s29] sm:$0xff]  ;;  %v280_v15 = vlaneseq  ;;  %s422_s21 = sshll.u32 %s687_s16, 3  ;;  %vm287_vm1 = vcmask 7168  }
  0x6a   : > { %v253_v0 = vld [vmem:[%s217_s5] sm:$0xff]  ;;  %v260_v4 = vmul.f32 %v251_v1, %v251_v1  ;;  %v263_v5 = vmul.f32 %v252_v2, %v252_v2  ;;  %v254_v6 = vmul.f32 %v252_v2, %v251_v1  ;;  %v282_v17 = vstv %s422_s21  ;;  %s646_s28 = smov 0.0   ;;  %p896_p8 = scmp.eq.s32.totalorder %s687_s16, 0 }
  0x6b   : > { %v266_v3 = vmul.f32 %v253_v0, %v253_v0  ;;  %v257_v7 = vmul.f32 %v253_v0, %v251_v1  ;;  %v281_v16 = vshrl.u32 %v280_v15, 7  ;;  %p456_p2 = scmp.eq.s32.totalorder %s687_s16, 2  ;;  %s587_s27 = scalar_lea.hbm %s883_s3, 16 }
  0x6c   : > { %261 = vadd.xlane.f32.xlu0 %v260_v4  ;;  %437 = sst [smem:[#allocation2]] (%p896_p8), %s646_s28  ;;  %p588_p5 = scmp.ne.s32.totalorder %s883_s3, %s587_s27 }
  0x6d   : > { %267 = vadd.xlane.f32.xlu1 %v266_v3  ;;  %v283_v22 = vadd.s32 %v282_v17, %v281_v16  ;;  %s286_s15 = sld [smem:[#allocation2]]  ;;  %p593_p9 = scmp.lt.u32.totalorder %s587_s27, %s883_s3 }
  0x6e   : > { %p589_p0 = pnand %p588_p5, %p456_p2 }
  0x6f   : > { %vm284_vm0 = vcmp.lt.s32.totalorder %v283_v22, 20 }
  0x70   : > { %264 = vadd.xlane.f32.xlu0 %v263_v5  ;;  %p590_p7 = pneg %p589_p0 }
  0x71   : > { %255 = vadd.xlane.f32.xlu1 %v254_v6 }
  0x72   : > { %p595_p4 = pnand %p593_p9, %p590_p7 }
  0x74   : > { %258 = vadd.xlane.f32.xlu0 %v257_v7 }
  0xf9   : > { %v262_v9 = vpop.xlane.xlu0 %261 }
  0xfa   : > { %v268_v8 = vpop.xlane.xlu1 %267 }
  0xfb   : > { %v273_v10 = vmul.f32 %v268_v8, %v262_v9 }
  0xfd   : > { %v274_v11 = vmax.f32 %v273_v10, 1e-16  ;;  %v265_v12 = vpop.xlane.xlu0 %264 }
  0xfe   : > { %v269_v13 = vmul.f32 %v265_v12, %v262_v9  ;;  %v256_v20 = vpop.xlane.xlu1 %255 }
  0xff   : > { %493 = vrsqrt.f32 %v274_v11 }
 0x100   : > { %v270_v14 = vmax.f32 %v269_v13, 1e-16 }
 0x101   : > { %v259_v19 = vpop.xlane.xlu0 %258 }
 0x102   : > { %495 = vrsqrt.f32 %v270_v14 }
 0x109   : > { %v494_v18 = vpop.eup %493 }
 0x10a   : > { %v276_v23 = vmul.f32 %v494_v18, %v259_v19 }
 0x10c   : > { %v496_v21 = vpop.eup %495 }
 0x10d   : > { %v272_v24 = vmul.f32 %v496_v21, %v256_v20 }
 0x10f   : > { %v277_v25 = vsub.f32 %v276_v23, %v272_v24 }
 0x111   : > { %v278_v26 = vmul.f32 2.0, %v277_v25 }
 0x113   : > { %v285_v27 = vsel %vm284_vm0, %v278_v26, 0.0 }
 0x114   : > { %v288_v28 = vsel %vm287_vm1, %v285_v27, 0.0 }
 0x115   : > { %289 = vadd.xlane.f32.xlu1 %v288_v28 }
 0x1a2   : > { %v290_v29 = vpop.xlane.xlu1 %289 }
 0x1a3   : > { %v291_v30 = vrot.slane %v290_v29, 4 }
 0x1a5   : > { %v292_v31 = vadd.f32 %v291_v30, %v290_v29 }
 0x1a7   : > { %v293_v32 = vrot.slane %v292_v31, 2 }
 0x1a9   : > { %v294_v33 = vadd.f32 %v293_v32, %v292_v31 }
 0x1ab   : > { %v295_v34 = vrot.slane %v294_v33, 1 }
 0x1ad   : > { %v296_v35 = vadd.f32 %v295_v34, %v294_v33 }
 0x1af   : > { %428 = vpush %v296_v35 }
 0x1e0   : > { %s429_s4 = spop %428 }
 0x1e1   : > { %s298_s12 = sadd.f32 %s429_s4, %s286_s15 }
 0x1e3   : > { %300 = sst [smem:[#allocation2]] %s298_s12  ;;  %s306_s18 = smul.f32 0.05, %s298_s12 }
 0x1e5   : > { %439 = sst [smem:[#allocation9]] (%p456_p2), %s306_s18 }
 0x1e6   : > { %598 = shalt.err (!%p595_p4)
}
 0x1e7   : > { %s647_s11 = smov [#allocation9]  }
 0x1e8   : > { %441 = dma.smem_to_hbm (%p456_p2), %s647_s11, 16, %s883_s3, [#allocation5]  }
 0x1e9   : > { %624 = dma.done.wait (%p456_p2), [#allocation5], 16  }
 0x1ea   : > { %626 = vsyncadd (%p456_p2), [#allocation5], 4294967280 }
 0x1eb   : > { %322 = sfence }
 0x1ec PF: > { %p17_p6 = scmp.ge.s32.totalorder %s690_s17, 5   ;;  %s897_s12 = smov %s633_s13 }
 0x1ed   : > { %s898_s13 = smov %s637_s14  ;;  %s899_s14 = smov %s700_s20 }
 0x1ee   : > { %s900_s15 = smov %s690_s17  ;;  %19 = sbr.rel (!%p17_p6) target bundleno = 6 (0x6), region = 104 }
 0x1f5   :  { %328 = vsyncpa [#allocation4], 1 }
 0x1f6   :  { %330 = vsyncpa [#allocation4 + $0x1], 1 }
 0x1f7   :  { %331 = vsyncpa [#allocation7], 1 }
 0x1f8   :  { %333 = vsyncpa [#allocation7 + $0x1], 1 }
 0x1f9   :  { %334 = vsyncpa [#allocation5], 1 }
 0x1fa   :  { %336 = vsyncpa [#allocation5 + $0x1], 1 }

</bundles_post_ra>
